<compile_context>
chip_gen: v7x
topology: tpu7x:2x2x1
jax: 0.10.0
libtpu: 0.0.40
codegen_flags: <defaults>
</compile_context>

<pallas_src>
import functools
import math

import jax
import jax.numpy as jnp
from jax.experimental import pallas as pl
from jax.experimental.pallas import tpu as pltpu

_LANES = 128


def _abs_diff_f32(a, b):
    """|a - b| computed in the (common) input dtype, widened to f32 afterwards."""
    return jnp.abs(a - b).astype(jnp.float32)


def _loss_sums_kernel(olens_ref, before_ref, after_ref, ys_ref,
                      dout_ref, xs_ref, zmu_ref, zlv_ref, vmu_ref, vlv_ref,
                      l1_ref, rc_ref, klz_ref, klv_ref,
                      *, odim, adim, zdim, vdim):
    """One (batch-slice, time-tile) step of the masked reductions.

    Grid: (n_par, n_t). Axis 0 = batch split (parallel), axis 1 = time reduction
    (arbitrary). Every streamed input is lane-folded to (bc, rows_D, 128).
    Outputs are (1, 8, 128) f32 blocks resident across axis 1 (accumulators).
    """
    t = pl.program_id(1)
    f32 = jnp.float32

    @pl.when(t == 0)
    def _init():
        l1_ref[...] = jnp.zeros_like(l1_ref)
        rc_ref[...] = jnp.zeros_like(rc_ref)
        klz_ref[...] = jnp.zeros_like(klz_ref)
        klv_ref[...] = jnp.zeros_like(klv_ref)

    bc = olens_ref.shape[0]
    olens = olens_ref[...]                       # (bc, 1, 1) int32

    mask_cache = {}

    def frame_mask(rows, d):
        """Non-pad mask for a lane-folded (bc, rows, 128) tile with feature dim d.

        Element (b, r, l) of this tile is flat index (t*rows + r)*128 + l of the
        flattened (T, d) array; it belongs to a non-pad frame iff flat < olen*d.
        """
        key = (rows, d)
        if key not in mask_cache:
            row_i = jax.lax.broadcasted_iota(jnp.int32, (bc, rows, _LANES), 1)
            lane_i = jax.lax.broadcasted_iota(jnp.int32, (bc, rows, _LANES), 2)
            flat = (t * rows + row_i) * _LANES + lane_i
            mask_cache[key] = flat < olens * d
        return mask_cache[key]

    def accumulate(acc_ref, vals):
        """acc(1,8,128) += sum(vals); pure vreg adds when sublane-tile aligned."""
        bcv, rows, lanes = vals.shape
        if rows % 8 == 0:
            tot = bcv * rows
            acc_ref[...] += jnp.sum(vals.reshape(1, tot // 8, 8, lanes), axis=1)
        else:  # tiny-shape fallback (partial vreg along sublanes)
            s = jnp.sum(vals, axis=(0, 1))[None, None, :]
            row0 = jax.lax.broadcasted_iota(jnp.int32, (1, 8, lanes), 1) == 0
            acc_ref[...] += jnp.where(row0, s, 0.0)

    # --- masked L1 terms: |before - ys| + |after - ys| ------------------------
    ys = ys_ref[...]
    m_o = frame_mask(ys_ref.shape[1], odim)
    l1_el = _abs_diff_f32(before_ref[...], ys) + _abs_diff_f32(after_ref[...], ys)
    accumulate(l1_ref, jnp.where(m_o, l1_el, 0.0))

    # --- VAE reconstruction: |d_out - xs| -------------------------------------
    m_a = frame_mask(xs_ref.shape[1], adim)
    rc_el = _abs_diff_f32(dout_ref[...], xs_ref[...])
    accumulate(rc_ref, jnp.where(m_a, rc_el, 0.0))

    # --- KL( N(mu, exp(lv)) || N(0,1) ) per element (f32) ----------------------
    def kl_into(acc_ref, mu_ref, lv_ref, d):
        m = frame_mask(mu_ref.shape[1], d)
        mu = mu_ref[...].astype(f32)
        lv = lv_ref[...].astype(f32)
        kl = -0.5 * (1.0 + lv - mu * mu - jnp.exp(lv))
        accumulate(acc_ref, jnp.where(m, kl, 0.0))

    kl_into(klz_ref, zmu_ref, zlv_ref, zdim)
    kl_into(klv_ref, vmu_ref, vlv_ref, vdim)


def _round_up(x, m):
    return ((x + m - 1) // m) * m


def _vmem_capacity_bytes():
    try:
        cap = getattr(pltpu.get_tpu_info(), "vmem_capacity_bytes", None)
        if cap:
            return int(cap)
    except Exception:
        pass
    return 64 * 1024 * 1024            # conservative (v7x-sized) fallback


def _tensorcores_per_chip():
    try:
        kind = jax.devices()[0].device_kind.lower()
    except Exception:
        return 1
    # v3/v4 (megacore) and v7x have 2 TensorCores per chip; v5e/v6e have 1.
    if any(tok in kind for tok in ("v7", "7x", "v3", "v4")):
        return 2
    return 1


def _fold_lanes(x, t_pad):
    """(B, T, D) -> lane-dense (B, T_pad*D/128, 128); free reshape when T == t_pad."""
    b, t, d = x.shape
    if t != t_pad:
        # TODO(synk): this pad is an extra HBM pass; only taken for awkward T_feats.
        x = jnp.pad(x, ((0, 0), (0, t_pad - t), (0, 0)))
    return x.reshape(b, (t_pad * d) // _LANES, _LANES)


def fastspeech_gw_loss(after_outs, before_outs, d_outs, p_outs, e_outs,
                       xs, ys, ps, es, ilens, olens, *, l1_lambda=1.0):
    """JAX/Pallas port of FastSpeechGWLoss.forward (default flags)."""
    del ilens  # lr_mode='after' -> duration mask uses olens
    B, Tf, odim = ys.shape
    adim = xs.shape[-1]
    zdim = d_outs["z_mu"].shape[-1]
    vdim = d_outs["v_mu"].shape[-1]
    f32 = jnp.float32

    streamed = [before_outs, after_outs, ys, d_outs["output"], xs,
                d_outs["z_mu"], d_outs["z_logvar"],
                d_outs["v_mu"], d_outs["v_logvar"]]
    dims = [odim, odim, odim, adim, adim, zdim, zdim, vdim, vdim]

    # T_pad: smallest T so that every (B, T, D) folds exactly to (B, T*D/128, 128).
    t_align = 1
    for d in dims:
        t_align = max(t_align, _LANES // math.gcd(_LANES, d))
    T_pad = _round_up(Tf, t_align)

    # Batch split only buys anything on multi-TensorCore chips.
    n_par = 2 if (_tensorcores_per_chip() == 2 and B % 2 == 0 and B >= 2) else 1
    bc = B // n_par

    # tile_t alignment so every tensor's folded tile keeps native sublane packing
    # ((8,128) for 4-byte dtypes, (16,128) for 2-byte dtypes); lane-dense bytes/frame.
    tile_align = 1
    bytes_per_frame = 0
    for x, d in zip(streamed, dims):
        isz = jnp.dtype(x.dtype).itemsize
        sub = max(8, 32 // isz)
        tile_align = max(tile_align, (sub * _LANES) // math.gcd(sub * _LANES, d))
        bytes_per_frame += isz * d

    # Chip-aware VMEM budget for the double-buffered, lane-dense input tiles.
    vmem_cap = _vmem_capacity_bytes()
    budget = min(40 * 1024 * 1024, int(vmem_cap * 0.45))
    vmem_limit = min(vmem_cap - 8 * 1024 * 1024, budget + 16 * 1024 * 1024)

    if T_pad <= tile_align:
        tile_t = T_pad                       # single tile: full-extent blocks
    else:
        cap_t = max(tile_align, budget // (2 * bc * bytes_per_frame))
        tile_t = max(tile_align, (cap_t // tile_align) * tile_align)
        tile_t = min(tile_t, (T_pad // tile_align) * tile_align)
    n_t = pl.cdiv(T_pad, tile_t)

    folded = [_fold_lanes(x, T_pad) for x in streamed]
    olens_i = jnp.minimum(olens.reshape(B).astype(jnp.int32), Tf)
    olens3 = olens_i.reshape(B, 1, 1)

    def data_spec(d):
        rows = (tile_t * d) // _LANES
        return pl.BlockSpec((bc, rows, _LANES), lambda b, t: (b, t, 0))

    acc_spec = pl.BlockSpec((1, 8, _LANES), lambda b, t: (b, 0, 0))
    acc_shape = jax.ShapeDtypeStruct((n_par, 8, _LANES), f32)

    total_frames = B * T_pad
    cost = pl.CostEstimate(
        flops=int(total_frames * (10 * (2 * odim + adim) + 14 * (zdim + vdim))),
        transcendentals=int(total_frames * (zdim + vdim)),
        bytes_accessed=int(sum(x.size * jnp.dtype(x.dtype).itemsize for x in folded)),
    )

    kernel = functools.partial(_loss_sums_kernel,
                               odim=odim, adim=adim, zdim=zdim, vdim=vdim)

    l1_p, rc_p, klz_p, klv_p = pl.pallas_call(
        kernel,
        grid=(n_par, n_t),
        in_specs=[pl.BlockSpec((bc, 1, 1), lambda b, t: (b, 0, 0))]  # olens (resident)
                 + [data_spec(d) for d in dims],
        out_specs=(acc_spec, acc_spec, acc_spec, acc_spec),
        out_shape=(acc_shape, acc_shape, acc_shape, acc_shape),
        compiler_params=pltpu.CompilerParams(
            dimension_semantics=("parallel", "arbitrary"),
            vmem_limit_bytes=int(vmem_limit)),
        cost_estimate=cost,
    )(olens3, *folded)

    # Number of non-pad frames = sum(min(olens, T_feats)).
    n_frames = jnp.sum(olens_i).astype(f32)

    l1_sum = jnp.sum(l1_p)
    rc_sum = jnp.sum(rc_p)
    klz_sum = jnp.sum(klz_p)
    klv_sum = jnp.sum(klv_p)

    # L1Loss(reduction='mean') over masked_select'd elements = sum / (n_frames * D)
    l1_loss = l1_sum / (n_frames * odim)
    rc_loss = rc_sum / (n_frames * adim)
    kl_loss_z = klz_sum / (n_frames * zdim)
    kl_loss_v = klv_sum / (n_frames * vdim)

    # Pitch / energy MSE: tiny unmasked (B, T_text, 1) tensors — plain XLA.
    pitch_loss = jnp.mean((p_outs["output"].astype(f32) - ps.astype(f32)) ** 2)
    energy_loss = jnp.mean((e_outs["output"].astype(f32) - es.astype(f32)) ** 2)

    return dict(
        l1_loss=l1_loss,
        duration_reconstruction=rc_loss / odim / l1_lambda,
        duration_kl_divergence=kl_loss_v / odim / l1_lambda,
        duration_z_kl_divergence=kl_loss_z / odim / l1_lambda,
        pitch_loss=pitch_loss,
        energy_loss=energy_loss,
    )


def _reference_loss(after_outs, before_outs, d_outs, p_outs, e_outs,
                    xs, ys, ps, es, ilens, olens, *, l1_lambda=1.0):
    """Pure-jnp reference (same dtype semantics as the kernel: native-dtype diffs,
    f32 accumulation)."""
    del ilens
    f32 = jnp.float32
    B, Tf, odim = ys.shape
    adim = xs.shape[-1]
    zdim = d_outs["z_mu"].shape[-1]
    vdim = d_outs["v_mu"].shape[-1]
    mask = jnp.arange(Tf)[None, :] < olens[:, None]
    m3 = mask[:, :, None]
    n = jnp.sum(mask).astype(f32)

    l1_el = _abs_diff_f32(before_outs, ys) + _abs_diff_f32(after_outs, ys)
    l1 = jnp.sum(jnp.where(m3, l1_el, 0.0)) / (n * odim)
    rc = jnp.sum(jnp.where(m3, _abs_diff_f32(d_outs["output"], xs), 0.0)) / (n * adim)

    def kl_sum(mu, lv):
        mu = mu.astype(f32)
        lv = lv.astype(f32)
        return jnp.sum(jnp.where(m3, -0.5 * (1.0 + lv - mu * mu - jnp.exp(lv)), 0.0))

    klz = kl_sum(d_outs["z_mu"], d_outs["z_logvar"]) / (n * zdim)
    klv = kl_sum(d_outs["v_mu"], d_outs["v_logvar"]) / (n * vdim)
    mp = jnp.mean((p_outs["output"].astype(f32) - ps.astype(f32)) ** 2)
    me = jnp.mean((e_outs["output"].astype(f32) - es.astype(f32)) ** 2)
    return dict(
        l1_loss=l1,
        duration_reconstruction=rc / odim / l1_lambda,
        duration_kl_divergence=klv / odim / l1_lambda,
        duration_z_kl_divergence=klz / odim / l1_lambda,
        pitch_loss=mp,
        energy_loss=me,
    )


if __name__ == "__main__":
    B, T_feats, T_text = 2, 64, 8
    odim, adim, zdim, vdim = 32, 32, 8, 8
    bf16 = jnp.bfloat16

    key = jax.random.PRNGKey(0)
    ks = jax.random.split(key, 12)

    # Large tensors in bf16 (kernel diffs in bf16, accumulates in f32); pitch/energy f32.
    after_outs = jax.random.normal(ks[0], (B, T_feats, odim), bf16)
    before_outs = jax.random.normal(ks[1], (B, T_feats, odim), bf16)
    ys = jax.random.normal(ks[2], (B, T_feats, odim), bf16)
    xs = jax.random.normal(ks[3], (B, T_feats, adim), bf16)

    d_outs = dict(
        output=jax.random.normal(ks[4], (B, T_feats, adim), bf16),
        z_mu=jax.random.normal(ks[5], (B, T_feats, zdim), bf16),
        z_logvar=(0.1 * jax.random.normal(ks[6], (B, T_feats, zdim))).astype(bf16),
        v_mu=jax.random.normal(ks[7], (B, T_feats, vdim), bf16),
        v_logvar=(0.1 * jax.random.normal(ks[8], (B, T_feats, vdim))).astype(bf16),
    )
    p_outs = dict(output=jax.random.normal(ks[9], (B, T_text, 1), jnp.float32))
    e_outs = dict(output=jax.random.normal(ks[10], (B, T_text, 1), jnp.float32))
    ps = jax.random.normal(ks[11], (B, T_text, 1), jnp.float32)
    es = jax.random.normal(jax.random.fold_in(key, 99), (B, T_text, 1), jnp.float32)

    ilens = jnp.array([8, 6], dtype=jnp.int32)
    olens = jnp.array([64, 49], dtype=jnp.int32)

    losses = fastspeech_gw_loss(after_outs, before_outs, d_outs, p_outs, e_outs,
                                xs, ys, ps, es, ilens, olens)
    losses = jax.tree_util.tree_map(jax.block_until_ready, losses)

    ref = _reference_loss(after_outs, before_outs, d_outs, p_outs, e_outs,
                          xs, ys, ps, es, ilens, olens)
    for k in ref:
        assert jnp.allclose(losses[k], ref[k], rtol=1e-5, atol=1e-5), (
            k, losses[k], ref[k])

    print("KERNEL_OK")
</pallas_src>

<mosaic_0001>
module attributes {stable_mosaic.version = 11 : i64} {
  func.func @_loss_sums_kernel(%arg0: i32, %arg1: i32, %arg2: memref<2x1x1xi32, #tpu.memory_space<vmem>>, %arg3: memref<2x16x128xbf16, #tpu.memory_space<vmem>>, %arg4: memref<2x16x128xbf16, #tpu.memory_space<vmem>>, %arg5: memref<2x16x128xbf16, #tpu.memory_space<vmem>>, %arg6: memref<2x16x128xbf16, #tpu.memory_space<vmem>>, %arg7: memref<2x16x128xbf16, #tpu.memory_space<vmem>>, %arg8: memref<2x4x128xbf16, #tpu.memory_space<vmem>>, %arg9: memref<2x4x128xbf16, #tpu.memory_space<vmem>>, %arg10: memref<2x4x128xbf16, #tpu.memory_space<vmem>>, %arg11: memref<2x4x128xbf16, #tpu.memory_space<vmem>>, %arg12: memref<1x8x128xf32, #tpu.memory_space<vmem>>, %arg13: memref<1x8x128xf32, #tpu.memory_space<vmem>>, %arg14: memref<1x8x128xf32, #tpu.memory_space<vmem>>, %arg15: memref<1x8x128xf32, #tpu.memory_space<vmem>>) attributes {dimension_semantics = [#tpu.dimension_semantics<parallel>, #tpu.dimension_semantics<arbitrary>], iteration_bounds = array<i64: 1, 1>, scalar_prefetch = 0 : i64, scratch_operands = 0 : i64, tpu.core_type = #tpu.core_type<tc>, window_params = [{transform_indices = @transform_0, window_bounds = array<i64: 2, 1, 1>}, {transform_indices = @transform_1, window_bounds = array<i64: 2, 16, 128>}, {transform_indices = @transform_2, window_bounds = array<i64: 2, 16, 128>}, {transform_indices = @transform_3, window_bounds = array<i64: 2, 16, 128>}, {transform_indices = @transform_4, window_bounds = array<i64: 2, 16, 128>}, {transform_indices = @transform_5, window_bounds = array<i64: 2, 16, 128>}, {transform_indices = @transform_6, window_bounds = array<i64: 2, 4, 128>}, {transform_indices = @transform_7, window_bounds = array<i64: 2, 4, 128>}, {transform_indices = @transform_8, window_bounds = array<i64: 2, 4, 128>}, {transform_indices = @transform_9, window_bounds = array<i64: 2, 4, 128>}, {transform_indices = @transform_10, window_bounds = array<i64: 1, 8, 128>}, {transform_indices = @transform_11, window_bounds = array<i64: 1, 8, 128>}, {transform_indices = @transform_12, window_bounds = array<i64: 1, 8, 128>}, {transform_indices = @transform_13, window_bounds = array<i64: 1, 8, 128>}]} {
    %c0_i32 = arith.constant 0 : i32
    %0 = arith.cmpi eq, %arg1, %c0_i32 : i32
    %1 = arith.extui %0 : i1 to i32
    %c0_i32_0 = arith.constant 0 : i32
    %2 = arith.cmpi ne, %1, %c0_i32_0 : i32
    scf.if %2 {
      %cst_70 = arith.constant 0.000000e+00 : f32
      %109 = vector.broadcast %cst_70 : f32 to vector<1x8x128xf32>
      %c0_71 = arith.constant 0 : index
      %c0_72 = arith.constant 0 : index
      %c0_73 = arith.constant 0 : index
      %110 = vector.load %arg12[%c0_71, %c0_72, %c0_73] : memref<1x8x128xf32, #tpu.memory_space<vmem>>, vector<1x8x128xf32>
      tpu.vector_store %arg12[%c0_71, %c0_72, %c0_73], %109 {strides = array<i32>} : memref<1x8x128xf32, #tpu.memory_space<vmem>>, vector<1x8x128xf32>,
      %cst_74 = arith.constant 0.000000e+00 : f32
      %111 = vector.broadcast %cst_74 : f32 to vector<1x8x128xf32>
      %c0_75 = arith.constant 0 : index
      %c0_76 = arith.constant 0 : index
      %c0_77 = arith.constant 0 : index
      %112 = vector.load %arg13[%c0_75, %c0_76, %c0_77] : memref<1x8x128xf32, #tpu.memory_space<vmem>>, vector<1x8x128xf32>
      tpu.vector_store %arg13[%c0_75, %c0_76, %c0_77], %111 {strides = array<i32>} : memref<1x8x128xf32, #tpu.memory_space<vmem>>, vector<1x8x128xf32>,
      %cst_78 = arith.constant 0.000000e+00 : f32
      %113 = vector.broadcast %cst_78 : f32 to vector<1x8x128xf32>
      %c0_79 = arith.constant 0 : index
      %c0_80 = arith.constant 0 : index
      %c0_81 = arith.constant 0 : index
      %114 = vector.load %arg14[%c0_79, %c0_80, %c0_81] : memref<1x8x128xf32, #tpu.memory_space<vmem>>, vector<1x8x128xf32>
      tpu.vector_store %arg14[%c0_79, %c0_80, %c0_81], %113 {strides = array<i32>} : memref<1x8x128xf32, #tpu.memory_space<vmem>>, vector<1x8x128xf32>,
      %cst_82 = arith.constant 0.000000e+00 : f32
      %115 = vector.broadcast %cst_82 : f32 to vector<1x8x128xf32>
      %c0_83 = arith.constant 0 : index
      %c0_84 = arith.constant 0 : index
      %c0_85 = arith.constant 0 : index
      %116 = vector.load %arg15[%c0_83, %c0_84, %c0_85] : memref<1x8x128xf32, #tpu.memory_space<vmem>>, vector<1x8x128xf32>
      tpu.vector_store %arg15[%c0_83, %c0_84, %c0_85], %115 {strides = array<i32>} : memref<1x8x128xf32, #tpu.memory_space<vmem>>, vector<1x8x128xf32>,
    } else {
    }
    %c0 = arith.constant 0 : index
    %c0_1 = arith.constant 0 : index
    %c0_2 = arith.constant 0 : index
    %3 = vector.load %arg2[%c0, %c0_1, %c0_2] : memref<2x1x1xi32, #tpu.memory_space<vmem>>, vector<2x1x1xi32>
    %c0_3 = arith.constant 0 : index
    %c0_4 = arith.constant 0 : index
    %c0_5 = arith.constant 0 : index
    %4 = vector.load %arg5[%c0_3, %c0_4, %c0_5] : memref<2x16x128xbf16, #tpu.memory_space<vmem>>, vector<2x16x128xbf16>
    %5 = tpu.iota {dimensions = array<i32: 1>} : vector<2x16x128xi32>
    %6 = tpu.iota {dimensions = array<i32: 2>} : vector<2x16x128xi32>
    %c16_i32 = arith.constant 16 : i32
    %7 = arith.muli %arg1, %c16_i32 : i32
    %8 = vector.broadcast %7 : i32 to vector<2x16x128xi32>
    %9 = arith.addi %8, %5 : vector<2x16x128xi32>
    %c128_i32 = arith.constant 128 : i32
    %10 = vector.broadcast %c128_i32 : i32 to vector<2x16x128xi32>
    %11 = arith.muli %9, %10 : vector<2x16x128xi32>
    %12 = arith.addi %11, %6 : vector<2x16x128xi32>
    %c32_i32 = arith.constant 32 : i32
    %13 = vector.broadcast %c32_i32 : i32 to vector<2x1x1xi32>
    %14 = arith.muli %3, %13 : vector<2x1x1xi32>
    %15 = vector.broadcast %14 : vector<2x1x1xi32> to vector<2x16x128xi32>
    %16 = arith.cmpi slt, %12, %15 : vector<2x16x128xi32>
    %c0_6 = arith.constant 0 : index
    %c0_7 = arith.constant 0 : index
    %c0_8 = arith.constant 0 : index
    %17 = vector.load %arg3[%c0_6, %c0_7, %c0_8] : memref<2x16x128xbf16, #tpu.memory_space<vmem>>, vector<2x16x128xbf16>
    %18 = arith.subf %17, %4 : vector<2x16x128xbf16>
    %19 = math.absf %18 : vector<2x16x128xbf16>
    %20 = arith.extf %19 : vector<2x16x128xbf16> to vector<2x16x128xf32>
    %c0_9 = arith.constant 0 : index
    %c0_10 = arith.constant 0 : index
    %c0_11 = arith.constant 0 : index
    %21 = vector.load %arg4[%c0_9, %c0_10, %c0_11] : memref<2x16x128xbf16, #tpu.memory_space<vmem>>, vector<2x16x128xbf16>
    %22 = arith.subf %21, %4 : vector<2x16x128xbf16>
    %23 = math.absf %22 : vector<2x16x128xbf16>
    %24 = arith.extf %23 : vector<2x16x128xbf16> to vector<2x16x128xf32>
    %25 = arith.addf %20, %24 : vector<2x16x128xf32>
    %cst = arith.constant 0.000000e+00 : f32
    %26 = vector.broadcast %cst : f32 to vector<2x16x128xf32>
    %27 = arith.select %16, %25, %26 : vector<2x16x128xi1>, vector<2x16x128xf32>
    %c0_12 = arith.constant 0 : index
    %c0_13 = arith.constant 0 : index
    %c0_14 = arith.constant 0 : index
    %28 = vector.load %arg12[%c0_12, %c0_13, %c0_14] : memref<1x8x128xf32, #tpu.memory_space<vmem>>, vector<1x8x128xf32>
    %29 = vector.shape_cast %27 : vector<2x16x128xf32> to vector<1x4x8x128xf32>
    %cst_15 = arith.constant dense<0.000000e+00> : vector<1x8x128xf32>
    %30 = vector.multi_reduction <add>, %29, %cst_15 [1] : vector<1x4x8x128xf32> to vector<1x8x128xf32>
    %31 = arith.addf %28, %30 : vector<1x8x128xf32>
    %c0_16 = arith.constant 0 : index
    %c0_17 = arith.constant 0 : index
    %c0_18 = arith.constant 0 : index
    %32 = vector.load %arg12[%c0_16, %c0_17, %c0_18] : memref<1x8x128xf32, #tpu.memory_space<vmem>>, vector<1x8x128xf32>
    tpu.vector_store %arg12[%c0_16, %c0_17, %c0_18], %31 {strides = array<i32>} : memref<1x8x128xf32, #tpu.memory_space<vmem>>, vector<1x8x128xf32>,
    %c0_19 = arith.constant 0 : index
    %c0_20 = arith.constant 0 : index
    %c0_21 = arith.constant 0 : index
    %33 = vector.load %arg6[%c0_19, %c0_20, %c0_21] : memref<2x16x128xbf16, #tpu.memory_space<vmem>>, vector<2x16x128xbf16>
    %c0_22 = arith.constant 0 : index
    %c0_23 = arith.constant 0 : index
    %c0_24 = arith.constant 0 : index
    %34 = vector.load %arg7[%c0_22, %c0_23, %c0_24] : memref<2x16x128xbf16, #tpu.memory_space<vmem>>, vector<2x16x128xbf16>
    %35 = arith.subf %33, %34 : vector<2x16x128xbf16>
    %36 = math.absf %35 : vector<2x16x128xbf16>
    %37 = arith.extf %36 : vector<2x16x128xbf16> to vector<2x16x128xf32>
    %cst_25 = arith.constant 0.000000e+00 : f32
    %38 = vector.broadcast %cst_25 : f32 to vector<2x16x128xf32>
    %39 = arith.select %16, %37, %38 : vector<2x16x128xi1>, vector<2x16x128xf32>
    %c0_26 = arith.constant 0 : index
    %c0_27 = arith.constant 0 : index
    %c0_28 = arith.constant 0 : index
    %40 = vector.load %arg13[%c0_26, %c0_27, %c0_28] : memref<1x8x128xf32, #tpu.memory_space<vmem>>, vector<1x8x128xf32>
    %41 = vector.shape_cast %39 : vector<2x16x128xf32> to vector<1x4x8x128xf32>
    %cst_29 = arith.constant dense<0.000000e+00> : vector<1x8x128xf32>
    %42 = vector.multi_reduction <add>, %41, %cst_29 [1] : vector<1x4x8x128xf32> to vector<1x8x128xf32>
    %43 = arith.addf %40, %42 : vector<1x8x128xf32>
    %c0_30 = arith.constant 0 : index
    %c0_31 = arith.constant 0 : index
    %c0_32 = arith.constant 0 : index
    %44 = vector.load %arg13[%c0_30, %c0_31, %c0_32] : memref<1x8x128xf32, #tpu.memory_space<vmem>>, vector<1x8x128xf32>
    tpu.vector_store %arg13[%c0_30, %c0_31, %c0_32], %43 {strides = array<i32>} : memref<1x8x128xf32, #tpu.memory_space<vmem>>, vector<1x8x128xf32>,
    %45 = tpu.iota {dimensions = array<i32: 1>} : vector<2x4x128xi32>
    %46 = tpu.iota {dimensions = array<i32: 2>} : vector<2x4x128xi32>
    %c4_i32 = arith.constant 4 : i32
    %47 = arith.muli %arg1, %c4_i32 : i32
    %48 = vector.broadcast %47 : i32 to vector<2x4x128xi32>
    %49 = arith.addi %48, %45 : vector<2x4x128xi32>
    %c128_i32_33 = arith.constant 128 : i32
    %50 = vector.broadcast %c128_i32_33 : i32 to vector<2x4x128xi32>
    %51 = arith.muli %49, %50 : vector<2x4x128xi32>
    %52 = arith.addi %51, %46 : vector<2x4x128xi32>
    %c8_i32 = arith.constant 8 : i32
    %53 = vector.broadcast %c8_i32 : i32 to vector<2x1x1xi32>
    %54 = arith.muli %3, %53 : vector<2x1x1xi32>
    %55 = vector.broadcast %54 : vector<2x1x1xi32> to vector<2x4x128xi32>
    %56 = arith.cmpi slt, %52, %55 : vector<2x4x128xi32>
    %c0_34 = arith.constant 0 : index
    %c0_35 = arith.constant 0 : index
    %c0_36 = arith.constant 0 : index
    %57 = vector.load %arg8[%c0_34, %c0_35, %c0_36] : memref<2x4x128xbf16, #tpu.memory_space<vmem>>, vector<2x4x128xbf16>
    %58 = arith.extf %57 : vector<2x4x128xbf16> to vector<2x4x128xf32>
    %c0_37 = arith.constant 0 : index
    %c0_38 = arith.constant 0 : index
    %c0_39 = arith.constant 0 : index
    %59 = vector.load %arg9[%c0_37, %c0_38, %c0_39] : memref<2x4x128xbf16, #tpu.memory_space<vmem>>, vector<2x4x128xbf16>
    %60 = arith.extf %59 : vector<2x4x128xbf16> to vector<2x4x128xf32>
    %cst_40 = arith.constant 1.000000e+00 : f32
    %61 = vector.broadcast %cst_40 : f32 to vector<2x4x128xf32>
    %62 = arith.addf %61, %60 : vector<2x4x128xf32>
    %63 = arith.mulf %58, %58 : vector<2x4x128xf32>
    %64 = arith.subf %62, %63 : vector<2x4x128xf32>
    %65 = math.exp %60 : vector<2x4x128xf32>
    %66 = arith.subf %64, %65 : vector<2x4x128xf32>
    %cst_41 = arith.constant -5.000000e-01 : f32
    %67 = vector.broadcast %cst_41 : f32 to vector<2x4x128xf32>
    %68 = arith.mulf %67, %66 : vector<2x4x128xf32>
    %cst_42 = arith.constant 0.000000e+00 : f32
    %69 = vector.broadcast %cst_42 : f32 to vector<2x4x128xf32>
    %70 = arith.select %56, %68, %69 : vector<2x4x128xi1>, vector<2x4x128xf32>
    %cst_43 = arith.constant dense<0.000000e+00> : vector<128xf32>
    %71 = vector.multi_reduction <add>, %70, %cst_43 [0, 1] : vector<2x4x128xf32> to vector<128xf32>
    %72 = vector.shape_cast %71 : vector<128xf32> to vector<1x1x128xf32>
    %73 = tpu.iota {dimensions = array<i32: 1>} : vector<1x8x128xi32>
    %c0_i32_44 = arith.constant 0 : i32
    %74 = vector.broadcast %c0_i32_44 : i32 to vector<1x8x128xi32>
    %75 = arith.cmpi eq, %73, %74 : vector<1x8x128xi32>
    %c0_45 = arith.constant 0 : index
    %c0_46 = arith.constant 0 : index
    %c0_47 = arith.constant 0 : index
    %76 = vector.load %arg14[%c0_45, %c0_46, %c0_47] : memref<1x8x128xf32, #tpu.memory_space<vmem>>, vector<1x8x128xf32>
    %cst_48 = arith.constant 0.000000e+00 : f32
    %77 = vector.shape_cast %72 : vector<1x1x128xf32> to vector<1x1x128xf32>
    %78 = vector.broadcast %77 : vector<1x1x128xf32> to vector<1x8x128xf32>
    %79 = vector.broadcast %cst_48 : f32 to vector<1x8x128xf32>
    %80 = arith.select %75, %78, %79 : vector<1x8x128xi1>, vector<1x8x128xf32>
    %81 = arith.addf %76, %80 : vector<1x8x128xf32>
    %c0_49 = arith.constant 0 : index
    %c0_50 = arith.constant 0 : index
    %c0_51 = arith.constant 0 : index
    %82 = vector.load %arg14[%c0_49, %c0_50, %c0_51] : memref<1x8x128xf32, #tpu.memory_space<vmem>>, vector<1x8x128xf32>
    tpu.vector_store %arg14[%c0_49, %c0_50, %c0_51], %81 {strides = array<i32>} : memref<1x8x128xf32, #tpu.memory_space<vmem>>, vector<1x8x128xf32>,
    %c0_52 = arith.constant 0 : index
    %c0_53 = arith.constant 0 : index
    %c0_54 = arith.constant 0 : index
    %83 = vector.load %arg10[%c0_52, %c0_53, %c0_54] : memref<2x4x128xbf16, #tpu.memory_space<vmem>>, vector<2x4x128xbf16>
    %84 = arith.extf %83 : vector<2x4x128xbf16> to vector<2x4x128xf32>
    %c0_55 = arith.constant 0 : index
    %c0_56 = arith.constant 0 : index
    %c0_57 = arith.constant 0 : index
    %85 = vector.load %arg11[%c0_55, %c0_56, %c0_57] : memref<2x4x128xbf16, #tpu.memory_space<vmem>>, vector<2x4x128xbf16>
    %86 = arith.extf %85 : vector<2x4x128xbf16> to vector<2x4x128xf32>
    %cst_58 = arith.constant 1.000000e+00 : f32
    %87 = vector.broadcast %cst_58 : f32 to vector<2x4x128xf32>
    %88 = arith.addf %87, %86 : vector<2x4x128xf32>
    %89 = arith.mulf %84, %84 : vector<2x4x128xf32>
    %90 = arith.subf %88, %89 : vector<2x4x128xf32>
    %91 = math.exp %86 : vector<2x4x128xf32>
    %92 = arith.subf %90, %91 : vector<2x4x128xf32>
    %cst_59 = arith.constant -5.000000e-01 : f32
    %93 = vector.broadcast %cst_59 : f32 to vector<2x4x128xf32>
    %94 = arith.mulf %93, %92 : vector<2x4x128xf32>
    %cst_60 = arith.constant 0.000000e+00 : f32
    %95 = vector.broadcast %cst_60 : f32 to vector<2x4x128xf32>
    %96 = arith.select %56, %94, %95 : vector<2x4x128xi1>, vector<2x4x128xf32>
    %cst_61 = arith.constant dense<0.000000e+00> : vector<128xf32>
    %97 = vector.multi_reduction <add>, %96, %cst_61 [0, 1] : vector<2x4x128xf32> to vector<128xf32>
    %98 = vector.shape_cast %97 : vector<128xf32> to vector<1x1x128xf32>
    %99 = tpu.iota {dimensions = array<i32: 1>} : vector<1x8x128xi32>
    %c0_i32_62 = arith.constant 0 : i32
    %100 = vector.broadcast %c0_i32_62 : i32 to vector<1x8x128xi32>
    %101 = arith.cmpi eq, %99, %100 : vector<1x8x128xi32>
    %c0_63 = arith.constant 0 : index
    %c0_64 = arith.constant 0 : index
    %c0_65 = arith.constant 0 : index
    %102 = vector.load %arg15[%c0_63, %c0_64, %c0_65] : memref<1x8x128xf32, #tpu.memory_space<vmem>>, vector<1x8x128xf32>
    %cst_66 = arith.constant 0.000000e+00 : f32
    %103 = vector.shape_cast %98 : vector<1x1x128xf32> to vector<1x1x128xf32>
    %104 = vector.broadcast %103 : vector<1x1x128xf32> to vector<1x8x128xf32>
    %105 = vector.broadcast %cst_66 : f32 to vector<1x8x128xf32>
    %106 = arith.select %101, %104, %105 : vector<1x8x128xi1>, vector<1x8x128xf32>
    %107 = arith.addf %102, %106 : vector<1x8x128xf32>
    %c0_67 = arith.constant 0 : index
    %c0_68 = arith.constant 0 : index
    %c0_69 = arith.constant 0 : index
    %108 = vector.load %arg15[%c0_67, %c0_68, %c0_69] : memref<1x8x128xf32, #tpu.memory_space<vmem>>, vector<1x8x128xf32>
    tpu.vector_store %arg15[%c0_67, %c0_68, %c0_69], %107 {strides = array<i32>} : memref<1x8x128xf32, #tpu.memory_space<vmem>>, vector<1x8x128xf32>,
    return
  }
  func.func @transform_0(%arg0: i32, %arg1: i32) -> (i32, i32, i32) {
    %c0_i32 = arith.constant 0 : i32
    %c0_i32_0 = arith.constant 0 : i32
    %c0_i32_1 = arith.constant 0 : i32
    return %arg0, %c0_i32, %c0_i32_0 : i32, i32, i32
  }
  func.func @transform_1(%arg0: i32, %arg1: i32) -> (i32, i32, i32) {
    %c0_i32 = arith.constant 0 : i32
    %c0_i32_0 = arith.constant 0 : i32
    return %arg0, %arg1, %c0_i32 : i32, i32, i32
  }
  func.func @transform_2(%arg0: i32, %arg1: i32) -> (i32, i32, i32) {
    %c0_i32 = arith.constant 0 : i32
    %c0_i32_0 = arith.constant 0 : i32
    return %arg0, %arg1, %c0_i32 : i32, i32, i32
  }
  func.func @transform_3(%arg0: i32, %arg1: i32) -> (i32, i32, i32) {
    %c0_i32 = arith.constant 0 : i32
    %c0_i32_0 = arith.constant 0 : i32
    return %arg0, %arg1, %c0_i32 : i32, i32, i32
  }
  func.func @transform_4(%arg0: i32, %arg1: i32) -> (i32, i32, i32) {
    %c0_i32 = arith.constant 0 : i32
    %c0_i32_0 = arith.constant 0 : i32
    return %arg0, %arg1, %c0_i32 : i32, i32, i32
  }
  func.func @transform_5(%arg0: i32, %arg1: i32) -> (i32, i32, i32) {
    %c0_i32 = arith.constant 0 : i32
    %c0_i32_0 = arith.constant 0 : i32
    return %arg0, %arg1, %c0_i32 : i32, i32, i32
  }
  func.func @transform_6(%arg0: i32, %arg1: i32) -> (i32, i32, i32) {
    %c0_i32 = arith.constant 0 : i32
    %c0_i32_0 = arith.constant 0 : i32
    return %arg0, %arg1, %c0_i32 : i32, i32, i32
  }
  func.func @transform_7(%arg0: i32, %arg1: i32) -> (i32, i32, i32) {
    %c0_i32 = arith.constant 0 : i32
    %c0_i32_0 = arith.constant 0 : i32
    return %arg0, %arg1, %c0_i32 : i32, i32, i32
  }
  func.func @transform_8(%arg0: i32, %arg1: i32) -> (i32, i32, i32) {
    %c0_i32 = arith.constant 0 : i32
    %c0_i32_0 = arith.constant 0 : i32
    return %arg0, %arg1, %c0_i32 : i32, i32, i32
  }
  func.func @transform_9(%arg0: i32, %arg1: i32) -> (i32, i32, i32) {
    %c0_i32 = arith.constant 0 : i32
    %c0_i32_0 = arith.constant 0 : i32
    return %arg0, %arg1, %c0_i32 : i32, i32, i32
  }
  func.func @transform_10(%arg0: i32, %arg1: i32) -> (i32, i32, i32) {
    %c0_i32 = arith.constant 0 : i32
    %c0_i32_0 = arith.constant 0 : i32
    %c0_i32_1 = arith.constant 0 : i32
    return %arg0, %c0_i32, %c0_i32_0 : i32, i32, i32
  }
  func.func @transform_11(%arg0: i32, %arg1: i32) -> (i32, i32, i32) {
    %c0_i32 = arith.constant 0 : i32
    %c0_i32_0 = arith.constant 0 : i32
    %c0_i32_1 = arith.constant 0 : i32
    return %arg0, %c0_i32, %c0_i32_0 : i32, i32, i32
  }
  func.func @transform_12(%arg0: i32, %arg1: i32) -> (i32, i32, i32) {
    %c0_i32 = arith.constant 0 : i32
    %c0_i32_0 = arith.constant 0 : i32
    %c0_i32_1 = arith.constant 0 : i32
    return %arg0, %c0_i32, %c0_i32_0 : i32, i32, i32
  }
  func.func @transform_13(%arg0: i32, %arg1: i32) -> (i32, i32, i32) {
    %c0_i32 = arith.constant 0 : i32
    %c0_i32_0 = arith.constant 0 : i32
    %c0_i32_1 = arith.constant 0 : i32
    return %arg0, %c0_i32, %c0_i32_0 : i32, i32, i32
  }
}

</mosaic_0001>

<bundles_post_ra>
// kernel: tpu_custom_call.1
= control target key start
LH: loop header
LB: loop body
LE: loop exit
PB: predicated region body
PF: predicated region fallthrough
CT: control target
= control target key end

     0   :  { %19 = vsyncpa [#allocation3], 0  ;;  %s859_s0 = inlined_call_operand.vmem [shape: s32[2,1,1], index: 0, kind: input, shape index: {}]   ;;  %s860_s1 = inlined_call_operand.hbm [shape: bf16[2,16,128], index: 1, kind: input, shape index: {}]   ;;  %s861_s2 = inlined_call_operand.hbm [shape: bf16[2,16,128], index: 2, kind: input, shape index: {}]   ;;  %s862_s3 = inlined_call_operand.hbm [shape: bf16[2,16,128], index: 3, kind: input, shape index: {}]   ;;  %s863_s4 = inlined_call_operand.vmem [shape: bf16[2,16,128], index: 4, kind: input, shape index: {}]   ;;  %s864_s5 = inlined_call_operand.hbm [shape: bf16[2,16,128], index: 5, kind: input, shape index: {}]   ;;  %s865_s6 = inlined_call_operand.vmem [shape: bf16[2,4,128], index: 6, kind: input, shape index: {}]   ;;  %s866_s7 = inlined_call_operand.vmem [shape: bf16[2,4,128], index: 7, kind: input, shape index: {}]   ;;  %s867_s8 = inlined_call_operand.vmem [shape: bf16[2,4,128], index: 8, kind: input, shape index: {}]   ;;  %s868_s9 = inlined_call_operand.vmem [shape: bf16[2,4,128], index: 9, kind: input, shape index: {}]   ;;  %s869_s10 = inlined_call_operand.hbm [shape: f32[1,8,128], index: 10, kind: output, shape index: {0}]   ;;  %s870_s11 = inlined_call_operand.hbm [shape: f32[1,8,128], index: 11, kind: output, shape index: {1}]   ;;  %s871_s12 = inlined_call_operand.hbm [shape: f32[1,8,128], index: 12, kind: output, shape index: {2}]   ;;  %s872_s13 = inlined_call_operand.hbm [shape: f32[1,8,128], index: 13, kind: output, shape index: {3}]  }
   0x1   :  { %20 = vsyncpa [#allocation6], 0 }
   0x2   :  { %21 = vsyncpa [#allocation9], 0 }
   0x3   :  { %22 = vsyncpa [#allocation4], 0 }
   0x4   :  { %23 = vsyncpa [#allocation12], 0 }
   0x5   :  { %24 = vsyncpa [#allocation15], 0  ;;  %s587_s25 = smov [#allocation5]   ;;  %s588_s27 = smov [#allocation2]  }
   0x6   :  { %s44_s26 = sshll.u32 %s587_s25, 4  ;;  %s32_s28 = sshll.u32 %s588_s27, 4  ;;  %s45_s26 = int_to_ptr.vmem [resolvable:$true] %s44_s26  ;;  %s668_s28 = int_to_ptr.vmem [resolvable:$true] %s32_s28 }
   0x7   :  { %s399_s14 = scalar_lea.hbm %s861_s2, 256 }
   0x8   :  { %p400_p0 = scmp.ne.s32.totalorder %s861_s2, %s399_s14  ;;  %p403_p1 = scmp.lt.u32.totalorder %s399_s14, %s861_s2 }
   0xa   :  { %p405_p2 = pnand %p403_p1, %p400_p0 }
   0xc   :  { %408 = shalt.err (!%p405_p2)
}
   0xd   :  { %s409_s19 = scalar_lea.vmem %s45_s26, 256  ;;  %p414_p4 = scmp.lt.s32.totalorder %s45_s26, %s45_s26 }
   0xe   :  { %p410_p3 = scmp.ne.s32.totalorder %s45_s26, %s409_s19  ;;  %p415_p5 = scmp.lt.s32.totalorder %s409_s19, %s409_s19 }
  0x10   :  { %p416_p6 = por %p415_p5, %p414_p4 }
  0x12   :  { %p417_p7 = pnand %p416_p6, %p410_p3 }
  0x14   :  { %420 = shalt.err (!%p417_p7)
}
  0x15   :  { %s589_s20 = smov 64   ;;  %s590_s21 = smov 4  }
  0x16   :  { %50 = dma.hbm_to_vmem [thread:$0]  %s861_s2, 256, %s45_s26, [#allocation6], %s589_s20, %s589_s20, %s590_s21  }
  0x17   :  { %s421_s27 = scalar_lea.hbm %s860_s1, 256 }
  0x18   :  { %p422_p8 = scmp.ne.s32.totalorder %s860_s1, %s421_s27  ;;  %p425_p9 = scmp.lt.u32.totalorder %s421_s27, %s860_s1 }
  0x1a   :  { %p427_p10 = pnand %p425_p9, %p422_p8 }
  0x1c   :  { %430 = shalt.err (!%p427_p10)
}
  0x1d   :  { %s431_s16 = scalar_lea.vmem %s668_s28, 256  ;;  %p436_p12 = scmp.lt.s32.totalorder %s668_s28, %s668_s28 }
  0x1e   :  { %p432_p11 = scmp.ne.s32.totalorder %s668_s28, %s431_s16  ;;  %p437_p13 = scmp.lt.s32.totalorder %s431_s16, %s431_s16 }
  0x20   :  { %p438_p0 = por %p437_p13, %p436_p12 }
  0x22   :  { %p439_p1 = pnand %p438_p0, %p432_p11 }
  0x24   :  { %442 = shalt.err (!%p439_p1)
}
  0x25   :  { %38 = dma.hbm_to_vmem [thread:$0]  %s860_s1, 256, %s668_s28, [#allocation3], %s589_s20, %s589_s20, %s590_s21  }
  0x26   :  { %s591_s17 = smov [#allocation7]   ;;  %s592_s19 = smov [#allocation8]  }
  0x27   :  { %s56_s18 = sshll.u32 %s591_s17, 4  ;;  %s70_s22 = sshll.u32 %s592_s19, 4  ;;  %s57_s18 = int_to_ptr.vmem [resolvable:$true] %s56_s18  ;;  %s705_s22 = int_to_ptr.vmem [resolvable:$true] %s70_s22 }
  0x28   :  { %s443_s25 = scalar_lea.hbm %s862_s3, 256 }
  0x29   :  { %p444_p2 = scmp.ne.s32.totalorder %s862_s3, %s443_s25  ;;  %p447_p3 = scmp.lt.u32.totalorder %s443_s25, %s862_s3 }
  0x2b   :  { %p449_p4 = pnand %p447_p3, %p444_p2 }
  0x2d   :  { %452 = shalt.err (!%p449_p4)
}
  0x2e   :  { %s453_s1 = scalar_lea.vmem %s57_s18, 256  ;;  %p458_p6 = scmp.lt.s32.totalorder %s57_s18, %s57_s18 }
  0x2f   :  { %p454_p5 = scmp.ne.s32.totalorder %s57_s18, %s453_s1  ;;  %p459_p7 = scmp.lt.s32.totalorder %s453_s1, %s453_s1 }
  0x31   :  { %p460_p8 = por %p459_p7, %p458_p6 }
  0x33   :  { %p461_p9 = pnand %p460_p8, %p454_p5 }
  0x35   :  { %464 = shalt.err (!%p461_p9)
}
  0x36   :  { %62 = dma.hbm_to_vmem [thread:$0]  %s862_s3, 256, %s57_s18, [#allocation6], %s589_s20, %s589_s20, %s590_s21  }
  0x37   :  { %s465_s26 = scalar_lea.hbm %s864_s5, 256 }
  0x38   :  { %p466_p10 = scmp.ne.s32.totalorder %s864_s5, %s465_s26  ;;  %p469_p11 = scmp.lt.u32.totalorder %s465_s26, %s864_s5 }
  0x3a   :  { %p471_p12 = pnand %p469_p11, %p466_p10 }
  0x3c   :  { %474 = shalt.err (!%p471_p12)
}
  0x3d   :  { %s475_s25 = scalar_lea.vmem %s705_s22, 256  ;;  %p480_p0 = scmp.lt.s32.totalorder %s705_s22, %s705_s22 }
  0x3e   :  { %p476_p13 = scmp.ne.s32.totalorder %s705_s22, %s475_s25  ;;  %p481_p1 = scmp.lt.s32.totalorder %s475_s25, %s475_s25 }
  0x40   :  { %p482_p2 = por %p481_p1, %p480_p0 }
  0x42   :  { %p483_p3 = pnand %p482_p2, %p476_p13 }
  0x44   :  { %486 = shalt.err (!%p483_p3)
}
  0x45   :  { %76 = dma.hbm_to_vmem [thread:$0]  %s864_s5, 256, %s705_s22, [#allocation9], %s589_s20, %s589_s20, %s590_s21  }
  0x46   :  { %575 = dma.done.wait [#allocation3], 256  }
  0x47   :  { %576 = vsyncadd [#allocation3], 4294967040 }
  0x48   :  { %577 = dma.done.wait [#allocation6], 512  }
  0x49   :  { %578 = vsyncadd [#allocation6], 4294966784 }
  0x4a   :  { %579 = dma.done.wait [#allocation9], 256  }
  0x4b   :  { %580 = vsyncadd [#allocation9], 4294967040  ;;  %v111_v0 = vlaneseq  ;;  %v593_v1 = vmov 0   ;;  %v105_v7 = vld [vmem:[%s859_s0] sm:$0x1]  ;;  %vm267_vm0 = vcmask 1043456  }
  0x4c   :  { %389 = vset.pattern.permute.xlu0 %v593_v1  ;;  %390 = vset.pattern.permute.xlu1 %v593_v1  ;;  %v106_v8 = vld [vmem:[%s859_s0 + $0x1] sm:$0x1]  ;;  %v225_v9 = vmul.u32 8, %v105_v7  ;;  %v124_v11 = vmul.u32 32, %v105_v7  ;;  %v248_v23 = vld [vmem:[%s866_s7 + $0x2] sm:$0x3] }
  0x4d   :  { %v742_v2 = vshrl.u32 %v111_v0, 7  ;;  %v115_v3 = vand.u32 127, %v111_v0  ;;  %v226_v10 = vmul.u32 8, %v106_v8  ;;  %v125_v12 = vmul.u32 32, %v106_v8  ;;  %v247_v20 = vld [vmem:[%s866_s7] sm:$0x3] }
  0x4e   :  { %v286_v21 = vld [vmem:[%s868_s9] sm:$0x3]  ;;  %v249_v22 = vunpack.c.l.bf16 %v247_v20  ;;  %v287_v25 = vld [vmem:[%s868_s9 + $0x2] sm:$0x3]  ;;  %v250_v26 = vunpack.c.l.bf16 %v248_v23  ;;  %v107_v38 = vld [vmem:[#allocation7] sm:$0xf] }
  0x4f   :  { %v120_v4 = vmul.u32 128, %v742_v2  ;;  %v128_v5 = vsub.s32 0, %v742_v2  ;;  %v113_v17 = vadd.s32 8, %v742_v2  ;;  %v288_v24 = vunpack.c.l.bf16 %v286_v21  ;;  %v243_v30 = vld [vmem:[%s865_s6] sm:$0x3]  ;;  %s595_s22 = smov [#allocation11]  }
  0x50   :  { %v257_v27 = vmul.f32 1.442695, %v249_v22  ;;  %v289_v28 = vunpack.c.l.bf16 %v287_v25  ;;  %v282_v31 = vld [vmem:[%s867_s8] sm:$0x3]  ;;  %v259_v32 = vmul.f32 1.442695, %v250_v26  ;;  %v245_v36 = vunpack.c.l.bf16 %v243_v30 }
  0x51   :  { %v746_v6 = vadd.s32 %v120_v4, %v115_v3  ;;  %v230_v13 = vrot.slane %v225_v9, %v128_v5  ;;  %v129_v14 = vrot.slane %v124_v11, %v128_v5  ;;  %v234_v15 = vrot.slane %v226_v10, %v128_v5  ;;  %v244_v34 = vld [vmem:[%s865_s6 + $0x2] sm:$0x3]  ;;  %v144_v39 = vld [vmem:[#allocation2] sm:$0xf]  ;;  %v108_v40 = vld [vmem:[#allocation7 + $0x4] sm:$0xf] }
  0x52   :  { %v133_v16 = vrot.slane %v125_v12, %v128_v5  ;;  %v121_v18 = vmul.u32 128, %v113_v17  ;;  %v296_v29 = vmul.f32 1.442695, %v288_v24  ;;  %391 = vpow2.f32 %v257_v27  ;;  %v283_v35 = vld [vmem:[%s867_s8 + $0x2] sm:$0x3]  ;;  %s335_s27 = sshll.u32 %s595_s22, 4  ;;  %s803_s27 = int_to_ptr.vmem [resolvable:$true] %s335_s27 }
  0x53   :  { %236 = vperm.xlu0 %389, %v230_v13   ;;  %135 = vperm.xlu1 %390, %v129_v14   ;;  %v298_v33 = vmul.f32 1.442695, %v289_v28  ;;  %v284_v37 = vunpack.c.l.bf16 %v282_v31  ;;  %v145_v41 = vld [vmem:[#allocation2 + $0x4] sm:$0xf]  ;;  %v160_v42 = vld [vmem:[#allocation5] sm:$0xf]  ;;  %v246_v43 = vunpack.c.l.bf16 %v244_v34  ;;  %v285_v44 = vunpack.c.l.bf16 %v283_v35 }
  0x54   :  { %v755_v19 = vadd.s32 %v121_v18, %v115_v3  ;;  %393 = vpow2.f32 %v296_v29  ;;  %v161_v45 = vld [vmem:[#allocation5 + $0x4] sm:$0xf]  ;;  %v251_v46 = vadd.f32 1.0, %v249_v22  ;;  %v290_v47 = vadd.f32 1.0, %v288_v24  ;;  %v109_v53 = vld [vmem:[#allocation7 + $0x8] sm:$0xf] }
  0x55   :  { %395 = vpow2.f32 %v259_v32  ;;  %v148_v48 = vsub.bf16 %v144_v39, %v107_v38  ;;  %v253_v49 = vmul.f32 %v245_v36, %v245_v36  ;;  %v292_v50 = vmul.f32 %v284_v37, %v284_v37  ;;  %v146_v54 = vld [vmem:[#allocation2 + $0x8] sm:$0xf]  ;;  %v162_v55 = vld [vmem:[#allocation5 + $0x8] sm:$0xf]  ;;  %v191_v59 = vld [vmem:[%s863_s4 + $0x4] sm:$0xf] }
  0x56   :  { %397 = vpow2.f32 %v298_v33  ;;  %v149_v51 = vsub.bf16 %v145_v41, %v108_v40  ;;  %v164_v52 = vsub.bf16 %v160_v42, %v107_v38  ;;  %v252_v56 = vadd.f32 1.0, %v250_v26  ;;  %v190_v58 = vld [vmem:[%s863_s4] sm:$0xf]  ;;  %v194_v60 = vld [vmem:[#allocation8] sm:$0xf] }
  0x57   :  { %239 = vperm.xlu0 %389, %v234_v15   ;;  %138 = vperm.xlu1 %390, %v133_v16   ;;  %v165_v57 = vsub.bf16 %v161_v45, %v108_v40  ;;  %v254_v61 = vmul.f32 %v246_v43, %v246_v43  ;;  %v293_v62 = vmul.f32 %v285_v44, %v285_v44  ;;  %v110_v63 = vld [vmem:[#allocation7 + $0xc] sm:$0xf]  ;;  %v163_v1 = vld [vmem:[#allocation5 + $0xc] sm:$0xf]  ;;  %v291_v3 = vadd.f32 1.0, %v289_v28 }
  0x58   :  { %v147_v0 = vld [vmem:[#allocation2 + $0xc] sm:$0xf]  ;;  %v152_v4 = vand.u32 2147450879, %v148_v48  ;;  %v195_v5 = vld [vmem:[#allocation8 + $0x4] sm:$0xf]  ;;  %v150_v7 = vsub.bf16 %v146_v54, %v109_v53  ;;  %v166_v8 = vsub.bf16 %v162_v55, %v109_v53  ;;  %v255_v10 = vsub.f32 %v251_v46, %v253_v49 }
  0x59   :  { %v294_v11 = vsub.f32 %v290_v47, %v292_v50  ;;  %v153_v12 = vand.u32 2147450879, %v149_v51  ;;  %v168_v13 = vand.u32 2147450879, %v164_v52  ;;  %v169_v15 = vand.u32 2147450879, %v165_v57 }
  0x5a   :  { %v151_v16 = vsub.bf16 %v147_v0, %v110_v63  ;;  %v167_v17 = vsub.bf16 %v163_v1, %v110_v63  ;;  %v256_v18 = vsub.f32 %v252_v56, %v254_v61  ;;  %v198_v20 = vsub.bf16 %v190_v58, %v194_v60  ;;  %v192_v22 = vld [vmem:[%s863_s4 + $0x8] sm:$0xf]  ;;  %v193_v23 = vld [vmem:[%s863_s4 + $0xc] sm:$0xf]  ;;  %v196_v24 = vld [vmem:[#allocation8 + $0x8] sm:$0xf] }
  0x5b   :  { %v199_v21 = vsub.bf16 %v191_v59, %v195_v5  ;;  %v295_v26 = vsub.f32 %v291_v3, %v293_v62  ;;  %v156_v27 = vunpack.c.l.bf16 %v152_v4  ;;  %v154_v28 = vand.u32 2147450879, %v150_v7  ;;  %v197_v30 = vld [vmem:[#allocation8 + $0xc] sm:$0xf]  ;;  %s594_s4 = smov [#allocation10]  }
  0x5c   :  { %v392_v9 = vpop.eup %391  ;;  %v170_v29 = vand.u32 2147450879, %v166_v8  ;;  %v157_v34 = vunpack.c.l.bf16 %v153_v12  ;;  %v172_v35 = vunpack.c.l.bf16 %v168_v13  ;;  %v173_v36 = vunpack.c.l.bf16 %v169_v15  ;;  %s325_s21 = sshll.u32 %s594_s4, 4  ;;  %s326_s21 = int_to_ptr.vmem [resolvable:$true] %s325_s21 }
  0x5d   :  { %v261_v32 = vsub.f32 %v255_v10, %v392_v9  ;;  %v155_v37 = vand.u32 2147450879, %v151_v16  ;;  %v171_v38 = vand.u32 2147450879, %v167_v17  ;;  %v200_v39 = vsub.bf16 %v192_v22, %v196_v24  ;;  %s487_s29 = scalar_lea.vmem %s326_s21, 128  ;;  %p492_p5 = scmp.lt.s32.totalorder %s326_s21, %s326_s21 }
  0x5e   :  { %v394_v14 = vpop.eup %393  ;;  %v202_v40 = vand.u32 2147450879, %v198_v20  ;;  %v203_v41 = vand.u32 2147450879, %v199_v21  ;;  %v201_v42 = vsub.bf16 %v193_v23, %v197_v30  ;;  %v158_v45 = vunpack.c.l.bf16 %v154_v28  ;;  %p488_p4 = scmp.ne.s32.totalorder %s326_s21, %s487_s29  ;;  %p493_p6 = scmp.lt.s32.totalorder %s487_s29, %s487_s29 }
  0x5f   :  { %v396_v25 = vpop.eup %395  ;;  %v300_v33 = vsub.f32 %v294_v11, %v394_v14  ;;  %v174_v46 = vunpack.c.l.bf16 %v170_v29  ;;  %v263_v47 = vmul.f32 -0.5, %v261_v32  ;;  %v176_v49 = vadd.f32 %v172_v35, %v156_v27 }
  0x60   :  { %v398_v31 = vpop.eup %397  ;;  %v262_v43 = vsub.f32 %v256_v18, %v396_v25  ;;  %v177_v50 = vadd.f32 %v173_v36, %v157_v34  ;;  %v159_v51 = vunpack.c.l.bf16 %v155_v37  ;;  %v175_v52 = vunpack.c.l.bf16 %v171_v38  ;;  %p494_p7 = por %p493_p6, %p492_p5 }
  0x61   :  { %v301_v44 = vsub.f32 %v295_v26, %v398_v31  ;;  %v302_v48 = vmul.f32 -0.5, %v300_v33  ;;  %v204_v53 = vand.u32 2147450879, %v200_v39  ;;  %v206_v55 = vunpack.c.l.bf16 %v202_v40 }
  0x62   :  { %v207_v56 = vunpack.c.l.bf16 %v203_v41  ;;  %v205_v57 = vand.u32 2147450879, %v201_v42  ;;  %v264_v58 = vmul.f32 -0.5, %v262_v43  ;;  %v178_v61 = vadd.f32 %v174_v46, %v158_v45  ;;  %p495_p8 = pnand %p494_p7, %p488_p4 }
  0x63   :  { %v303_v59 = vmul.f32 -0.5, %v301_v44  ;;  %v179_v3 = vadd.f32 %v175_v52, %v159_v51  ;;  %v208_v4 = vunpack.c.l.bf16 %v204_v53 }
  0x64   :  { %v209_v10 = vunpack.c.l.bf16 %v205_v57 }
  0xd2   :  { %v237_v54 = vpop.permute.xlu0 %236  ;;  %v136_v60 = vpop.permute.xlu1 %135 }
  0xd3   :  { %vm241_vm1 = vcmp.lt.s32.totalorder %v746_v6, %v237_v54  ;;  %vm140_vm2 = vcmp.lt.s32.totalorder %v746_v6, %v136_v60  ;;  %vm141_vm3 = vcmp.lt.s32.totalorder %v755_v19, %v136_v60 }
  0xd4   :  { %v265_v62 = vsel %vm241_vm1, %v263_v47, 0.0  ;;  %v304_v63 = vsel %vm241_vm1, %v302_v48, 0.0  ;;  %v180_v0 = vsel %vm140_vm2, %v176_v49, 0.0  ;;  %v181_v1 = vsel %vm141_vm3, %v177_v50, 0.0 }
  0xd5   :  { %v185_v7 = vadd.f32 %v181_v1, %v180_v0  ;;  %v210_v8 = vsel %vm140_vm2, %v206_v55, 0.0  ;;  %v211_v9 = vsel %vm141_vm3, %v207_v56, 0.0  ;;  %v268_v11 = vsel %vm267_vm0, %v265_v62, 0.0 }
  0xd6   :  { %v240_v5 = vpop.permute.xlu0 %239  ;;  %v306_v12 = vsel %vm267_vm0, %v304_v63, 0.0  ;;  %v215_v13 = vadd.f32 %v211_v9, %v210_v8  ;;  %v139_v14 = vpop.permute.xlu1 %138 }
  0xd7   :  { %vm242_vm4 = vcmp.lt.s32.totalorder %v746_v6, %v240_v5  ;;  %vm142_vm5 = vcmp.lt.s32.totalorder %v746_v6, %v139_v14  ;;  %vm143_vm6 = vcmp.lt.s32.totalorder %v755_v19, %v139_v14 }
  0xd8   :  { %v266_v15 = vsel %vm242_vm4, %v264_v58, 0.0  ;;  %v305_v16 = vsel %vm242_vm4, %v303_v59, 0.0  ;;  %v182_v20 = vsel %vm142_vm5, %v178_v61, 0.0  ;;  %v183_v21 = vsel %vm143_vm6, %v179_v3, 0.0 }
  0xd9   :  { %v269_v17 = vsel %vm267_vm0, %v266_v15, 0.0  ;;  %v307_v18 = vsel %vm267_vm0, %v305_v16, 0.0  ;;  %v186_v24 = vadd.f32 %v185_v7, %v182_v20  ;;  %v212_v25 = vsel %vm142_vm5, %v208_v4, 0.0 }
  0xda   :  { %v270_v22 = vadd.f32 %v269_v17, %v268_v11  ;;  %v308_v23 = vadd.f32 %v307_v18, %v306_v12  ;;  %v213_v26 = vsel %vm143_vm6, %v209_v10, 0.0  ;;  %v216_v27 = vadd.f32 %v215_v13, %v212_v25 }
  0xdb   :  { %v187_v30 = vadd.f32 %v186_v24, %v183_v21 }
  0xdc   :  { %v271_v28 = vrot.slane %v270_v22, 4  ;;  %v309_v29 = vrot.slane %v308_v23, 4  ;;  %v217_v6 = vadd.f32 %v216_v27, %v213_v26 }
  0xdd   :  { %189 = vst [vmem:[#allocation10] sm:$0xff] %v187_v30 }
  0xde   :  { %v272_v19 = vadd.f32 %v271_v28, %v270_v22  ;;  %v310_v31 = vadd.f32 %v309_v29, %v308_v23  ;;  %219 = vst [vmem:[#allocation11] sm:$0xff] %v217_v6 }
  0xe0   :  { %v273_v32 = vrot.slane %v272_v19, 2  ;;  %v311_v33 = vrot.slane %v310_v31, 2 }
  0xe1   :  { %498 = shalt.err (!%p495_p8)
}
  0xe2   :  { %s499_s14 = scalar_lea.hbm %s869_s10, 128 }
  0xe3   :  { %p500_p9 = scmp.ne.s32.totalorder %s869_s10, %s499_s14  ;;  %p503_p10 = scmp.lt.u32.totalorder %s499_s14, %s869_s10 }
  0xe5   :  { %p505_p11 = pnand %p503_p10, %p500_p9 }
  0xe7   :  { %508 = shalt.err (!%p505_p11)
}
  0xe8   :  { %328 = dma.vmem_to_hbm [thread:$0]  %s326_s21, 128, %s869_s10, [#allocation4]   ;;  %v274_v34 = vadd.f32 %v273_v32, %v272_v19  ;;  %v312_v35 = vadd.f32 %v311_v33, %v310_v31 }
  0xe9   :  { %s509_s17 = scalar_lea.vmem %s803_s27, 128  ;;  %p514_p13 = scmp.lt.s32.totalorder %s803_s27, %s803_s27 }
  0xea   :  { %p510_p12 = scmp.ne.s32.totalorder %s803_s27, %s509_s17  ;;  %p515_p0 = scmp.lt.s32.totalorder %s509_s17, %s509_s17 }
  0xec   :  { %p516_p1 = por %p515_p0, %p514_p13 }
  0xee   :  { %p517_p2 = pnand %p516_p1, %p510_p12 }
  0xf0   :  { %520 = shalt.err (!%p517_p2)
}
  0xf1   :  { %s521_s9 = scalar_lea.hbm %s870_s11, 128 }
  0xf2   :  { %p522_p3 = scmp.ne.s32.totalorder %s870_s11, %s521_s9  ;;  %p525_p4 = scmp.lt.u32.totalorder %s521_s9, %s870_s11 }
  0xf4   :  { %p527_p5 = pnand %p525_p4, %p522_p3 }
  0xf6   :  { %530 = shalt.err (!%p527_p5)
}
  0xf7   :  { %338 = dma.vmem_to_hbm [thread:$0]  %s803_s27, 128, %s870_s11, [#allocation12]   ;;  %v275_v36 = vrot.slane %v274_v34, 1  ;;  %v313_v37 = vrot.slane %v312_v35, 1  ;;  %vm277_vm7 = vcmp.eq.s32.totalorder %v742_v2, 0 }
  0xf8   :  { %s596_s3 = smov [#allocation13]   ;;  %s597_s5 = smov [#allocation14]  }
  0xf9   :  { %v276_v38 = vadd.f32 %v275_v36, %v274_v34  ;;  %v314_v39 = vadd.f32 %v313_v37, %v312_v35  ;;  %s345_s18 = sshll.u32 %s596_s3, 4  ;;  %s355_s20 = sshll.u32 %s597_s5, 4  ;;  %s346_s18 = int_to_ptr.vmem [resolvable:$true] %s345_s18  ;;  %s356_s20 = int_to_ptr.vmem [resolvable:$true] %s355_s20 }
  0xfa   :  { %s531_s4 = scalar_lea.vmem %s346_s18, 128  ;;  %p536_p7 = scmp.lt.s32.totalorder %s346_s18, %s346_s18 }
  0xfb   :  { %v279_v40 = vsel %vm277_vm7, %v276_v38, 0.0  ;;  %v316_v41 = vsel %vm277_vm7, %v314_v39, 0.0  ;;  %p532_p6 = scmp.ne.s32.totalorder %s346_s18, %s531_s4  ;;  %p537_p8 = scmp.lt.s32.totalorder %s531_s4, %s531_s4 }
  0xfc   :  { %281 = vst [vmem:[#allocation13] sm:$0xff] %v279_v40  ;;  %318 = vst [vmem:[#allocation14] sm:$0xff] %v316_v41 }
  0xfd   :  { %p538_p9 = por %p537_p8, %p536_p7 }
  0xff   :  { %p539_p10 = pnand %p538_p9, %p532_p6 }
 0x101   :  { %542 = shalt.err (!%p539_p10)
}
 0x102   :  { %s543_s22 = scalar_lea.hbm %s871_s12, 128 }
 0x103   :  { %p544_p11 = scmp.ne.s32.totalorder %s871_s12, %s543_s22  ;;  %p547_p12 = scmp.lt.u32.totalorder %s543_s22, %s871_s12 }
 0x105   :  { %p549_p13 = pnand %p547_p12, %p544_p11 }
 0x107   :  { %552 = shalt.err (!%p549_p13)
}
 0x108   :  { %348 = dma.vmem_to_hbm [thread:$0]  %s346_s18, 128, %s871_s12, [#allocation12]  }
 0x109   :  { %s553_s28 = scalar_lea.vmem %s356_s20, 128  ;;  %p558_p1 = scmp.lt.s32.totalorder %s356_s20, %s356_s20 }
 0x10a   :  { %p554_p0 = scmp.ne.s32.totalorder %s356_s20, %s553_s28  ;;  %p559_p2 = scmp.lt.s32.totalorder %s553_s28, %s553_s28 }
 0x10c   :  { %p560_p3 = por %p559_p2, %p558_p1 }
 0x10e   :  { %p561_p4 = pnand %p560_p3, %p554_p0 }
 0x110   :  { %564 = shalt.err (!%p561_p4)
}
 0x111   :  { %s565_s2 = scalar_lea.hbm %s872_s13, 128 }
 0x112   :  { %p566_p5 = scmp.ne.s32.totalorder %s872_s13, %s565_s2  ;;  %p569_p6 = scmp.lt.u32.totalorder %s565_s2, %s872_s13 }
 0x114   :  { %p571_p7 = pnand %p569_p6, %p566_p5 }
 0x116   :  { %574 = shalt.err (!%p571_p7)
}
 0x117   :  { %358 = dma.vmem_to_hbm [thread:$0]  %s356_s20, 128, %s872_s13, [#allocation15]  }
 0x118   :  { %581 = dma.done.wait [#allocation4], 128  }
 0x119   :  { %582 = vsyncadd [#allocation4], 4294967168 }
 0x11a   :  { %583 = dma.done.wait [#allocation12], 256  }
 0x11b   :  { %584 = vsyncadd [#allocation12], 4294967040 }
 0x11c   :  { %585 = dma.done.wait [#allocation15], 128  }
 0x11d   :  { %586 = vsyncadd [#allocation15], 4294967168 }
 0x11e   :  { %371 = vsyncpa [#allocation3], 1 }
 0x11f   :  { %372 = vsyncpa [#allocation6], 1 }
 0x120   :  { %373 = vsyncpa [#allocation9], 1 }
 0x121   :  { %374 = vsyncpa [#allocation4], 1 }
 0x122   :  { %375 = vsyncpa [#allocation12], 1 }
 0x123   :  { %376 = vsyncpa [#allocation15], 1 }

</bundles_post_ra>
